<compile_context>
chip_gen: v7x
topology: tpu7x:2x2x1
jax: 0.10.0
libtpu: 0.0.40
codegen_flags: <defaults>
</compile_context>

<pallas_src>
import functools
import math

import jax
import jax.numpy as jnp
from jax import lax
from jax.experimental import pallas as pl
from jax.experimental.pallas import tpu as pltpu


def _enres_kernel(x_ref, w_ref, shift_ref, o_ref, *, seq_len, has_proj):
    """One lane-dense block of whole samples per grid step.

    x_ref    : (C_in_p, TBL)            input slab (compute dtype)
    w_ref    : (KW, C_out_p, C_in_p)    taps 0..2 = conv (BN scale pre-folded),
                                        tap 3 (if has_proj) = 1x1 projection
    shift_ref: (C_out_p, 1) f32         folded BN shift = beta - mean * scale
    o_ref    : (C_out_p, TBL)           output (f32 or bf16)
    """
    x = x_ref[...]
    tbl = x.shape[-1]
    zero = jnp.zeros((), x.dtype)

    # per-lane position inside its length-L sample (blocks are sample-aligned,
    # so an in-kernel iota replaces the old DMA'd position array).
    col = lax.broadcasted_iota(jnp.int32, (1, tbl), 1)
    if (seq_len & (seq_len - 1)) == 0:
        pos = col & (seq_len - 1)          # power-of-two fast path (VPU and)
    else:
        pos = col % seq_len

    # k=3 / padding=1 halo: XLU rolls give the +-1 shifted copies; the edge mask
    # zeroes both the conv padding positions and cross-sample / wrap leakage.
    x_prev = jnp.where(pos == 0, zero, pltpu.roll(x, shift=1, axis=1))
    x_next = jnp.where(pos == seq_len - 1, zero,
                       pltpu.roll(x, shift=tbl - 1, axis=1))

    # Three accumulated MXU matmuls (f32 accumulate) — no im2col concatenate.
    acc = jnp.dot(w_ref[0], x_prev, preferred_element_type=jnp.float32)
    acc = acc + jnp.dot(w_ref[1], x, preferred_element_type=jnp.float32)
    acc = acc + jnp.dot(w_ref[2], x_next, preferred_element_type=jnp.float32)

    out = jnp.maximum(acc + shift_ref[...], 0.0)           # BN(eval) shift + ReLU
    if has_proj:
        res = jnp.dot(w_ref[3], x, preferred_element_type=jnp.float32)  # 1x1 proj
    else:
        res = x.astype(jnp.float32)                         # identity skip
    o_ref[...] = (out + res).astype(o_ref.dtype)


def _round_up(v, m):
    return (v + m - 1) // m * m


def _vmem_params():
    """(usable VMEM budget bytes, lane target per block, min #blocks hint)."""
    cap = 64 * 2**20                      # conservative fallback (v7x per-TC VMEM)
    try:
        cap = int(pltpu.get_tpu_info().vmem_capacity_bytes)
    except Exception:
        pass
    if cap <= 64 * 2**20:                 # v7x-class: 64 MiB/TC, 2 TensorCores/chip
        return min(cap - 16 * 2**20, (3 * cap) // 4), 2048, 2
    return min(cap - 24 * 2**20, (3 * cap) // 4), 4096, 1   # v5e / v6e: 128 MiB


def _choose_samples_per_block(n, seq_len, per_lane_bytes, fixed_bytes,
                              vmem_budget, lane_target, min_blocks):
    """Samples per lane-dense block.  Blocks are sample-aligned; in the tiled
    case the block width is a multiple of 128 lanes and the wrapper pads N so
    every block is full (unmasked dense stores, no partial-tail masking)."""
    avail = max(vmem_budget - fixed_bytes, seq_len * per_lane_bytes)
    max_lanes = max(seq_len, avail // per_lane_bytes)
    lane_target = max(seq_len, min(lane_target, max_lanes))
    total = n * seq_len

    tb_align = 128 // math.gcd(seq_len, 128)   # min samples for 128-aligned width
    align_lanes = tb_align * seq_len

    want_split = min_blocks > 1 and total >= min_blocks * align_lanes
    if total <= lane_target and not want_split:
        return n                               # single block = full padded width
    block_lanes = max(align_lanes, lane_target // align_lanes * align_lanes)
    if min_blocks > 1:                         # keep both v7x TensorCores busy
        per_core = _round_up(pl.cdiv(total, min_blocks), align_lanes)
        block_lanes = max(align_lanes, min(block_lanes, per_core))
    return block_lanes // seq_len


@functools.partial(jax.jit, static_argnames=("eps", "compute_dtype", "out_dtype",
                                              "max_block_lanes"))
def enres_block(x, w1, gamma, beta, run_mean, run_var, wres=None, *,
                eps=1e-5, compute_dtype=jnp.float32, out_dtype=jnp.float32,
                max_block_lanes=None):
    """EnResBlock.forward (eval mode).

    x: (N, C_in, L); w1: (C_out, C_in, 3); wres: (C_out, C_in) or None.
    Returns (N, C_out, L) in `out_dtype`.  compute_dtype=bfloat16 is recommended
    on all TPU generations (bf16-native MXU, f32 accumulation); out_dtype=bfloat16
    halves the HBM writeback when the consumer accepts bf16.
    """
    N, C_in, L = x.shape
    C_out = w1.shape[0]
    if wres is None and C_in != C_out:
        raise ValueError("wres (1x1 projection) is required when C_in != C_out")
    has_proj = wres is not None
    n_taps = 4 if has_proj else 3

    cdt = jnp.dtype(compute_dtype)
    odt = jnp.dtype(out_dtype)
    # pad channel dims to the native sublane tile (8 for f32, 16 when any bf16)
    sub = 8 if (cdt.itemsize >= 4 and odt.itemsize >= 4) else 16
    C_in_p, C_out_p = _round_up(C_in, sub), _round_up(C_out, sub)

    # ---- generation-aware block sizing (double-buffering + temporaries counted)
    vmem_budget, lane_target, min_blocks = _vmem_params()
    if max_block_lanes is not None:
        lane_target = min(lane_target, int(max_block_lanes))
    per_lane = (4 * C_in_p * cdt.itemsize      # x block x2 (pipeline) + 2 roll temps
                + 2 * C_out_p * odt.itemsize   # out block x2 (pipeline)
                + 2 * C_out_p * 4              # f32 accumulator / epilogue temps
                + 8)
    fixed = (2 * n_taps * C_out_p * C_in_p * cdt.itemsize   # weights (2 buffers)
             + 2 * C_out_p * 4 + (2 << 20))                 # shift + compiler slack
    tb = _choose_samples_per_block(N, L, per_lane, fixed, vmem_budget,
                                   lane_target, min_blocks)
    N_pad = _round_up(N, tb)
    tbl = tb * L
    need = fixed + per_lane * tbl
    vmem_limit = int(min(max(need + (4 << 20), 32 * 2**20),
                         max(vmem_budget, need + (4 << 20))))

    # ---- lane-dense re-layout: (N, C_in, L) -> (C_in_p, N_pad*L)
    xp = jnp.pad(x, ((0, N_pad - N), (0, C_in_p - C_in), (0, 0)))
    x2d = jnp.transpose(xp, (1, 0, 2)).reshape(C_in_p, N_pad * L).astype(cdt)

    # ---- BatchNorm1d(eval) folded: scale into the conv taps, shift to epilogue
    scale = gamma / jnp.sqrt(run_var + eps)
    shift = beta - run_mean * scale
    shift2d = jnp.pad(shift, (0, C_out_p - C_out)).reshape(C_out_p, 1)
    shift2d = shift2d.astype(jnp.float32)

    wk = jnp.transpose(w1, (2, 0, 1)) * scale[None, :, None]     # (3, C_out, C_in)
    wk = jnp.pad(wk, ((0, 0), (0, C_out_p - C_out), (0, C_in_p - C_in)))
    if has_proj:
        wr = jnp.pad(wres, ((0, C_out_p - C_out), (0, C_in_p - C_in)))
        w_all = jnp.concatenate([wk, wr[None].astype(wk.dtype)], axis=0)
    else:
        w_all = wk
    w_all = w_all.astype(cdt)                                # (n_taps, C_out_p, C_in_p)

    grid = (N_pad // tb,)
    kernel = functools.partial(_enres_kernel, seq_len=L, has_proj=has_proj)
    grid_spec = pltpu.PrefetchScalarGridSpec(
        num_scalar_prefetch=0,
        grid=grid,
        in_specs=[
            pl.BlockSpec((C_in_p, tbl), lambda i: (0, i)),                 # x slab
            pl.BlockSpec((n_taps, C_out_p, C_in_p), lambda i: (0, 0, 0)),  # weights
            pl.BlockSpec((C_out_p, 1), lambda i: (0, 0)),                  # BN shift
        ],
        out_specs=pl.BlockSpec((C_out_p, tbl), lambda i: (0, i)),
    )
    y2d = pl.pallas_call(
        kernel,
        out_shape=jax.ShapeDtypeStruct((C_out_p, N_pad * L), odt),
        grid_spec=grid_spec,
        compiler_params=pltpu.CompilerParams(
            dimension_semantics=("parallel",),
            vmem_limit_bytes=vmem_limit),
    )(x2d, w_all, shift2d)

    # back to the module's (N, C_out, L) layout (drop channel / batch padding)
    y = y2d[:C_out].reshape(C_out, N_pad, L)[:, :N]
    return jnp.transpose(y, (1, 0, 2))


def _reference(x, w1, gamma, beta, run_mean, run_var, wres=None, eps=1e-5,
               fold_bn=False):
    """Pure-JAX reference for PyTorch EnResBlock eval-mode forward.

    fold_bn=True applies the algebraically identical BN-scale-into-weights
    rearrangement the kernel uses (for tight numeric comparison)."""
    scale = gamma / jnp.sqrt(run_var + eps)
    shift = beta - run_mean * scale
    w = w1 * scale[:, None, None] if fold_bn else w1
    out = lax.conv_general_dilated(
        x, w, window_strides=(1,), padding=((1, 1),),
        dimension_numbers=("NCH", "OIH", "NCH"))
    if fold_bn:
        out = out + shift[None, :, None]
    else:
        out = out * scale[None, :, None] + shift[None, :, None]
    out = jnp.maximum(out, 0.0)
    if wres is None:
        res = x
    else:
        res = lax.conv_general_dilated(
            x, wres[:, :, None], window_strides=(1,), padding=((0, 0),),
            dimension_numbers=("NCH", "OIH", "NCH"))
    return out + res


if __name__ == "__main__":
    key = jax.random.PRNGKey(0)

    def make_case(k, n, c_in, c_out, seq, with_proj):
        ks = jax.random.split(k, 7)
        x = jax.random.normal(ks[0], (n, c_in, seq), dtype=jnp.float32)
        bound = (6.0 / (c_in * 3 + c_out * 3)) ** 0.5          # xavier_uniform_
        w1 = jax.random.uniform(ks[1], (c_out, c_in, 3), minval=-bound,
                                maxval=bound, dtype=jnp.float32)
        gamma = 1.0 + 0.1 * jax.random.normal(ks[2], (c_out,), dtype=jnp.float32)
        beta = 0.1 * jax.random.normal(ks[3], (c_out,), dtype=jnp.float32)
        mean = 0.05 * jax.random.normal(ks[4], (c_out,), dtype=jnp.float32)
        var = 1.0 + 0.1 * jax.random.uniform(ks[5], (c_out,), dtype=jnp.float32)
        wres = None
        if with_proj:
            kb = 1.0 / (c_in ** 0.5)                           # conv1d default init
            wres = jax.random.uniform(ks[6], (c_out, c_in), minval=-kb,
                                      maxval=kb, dtype=jnp.float32)
        return x, w1, gamma, beta, mean, var, wres

    # identity-skip (C_in == C_out) and 1x1-projection variants, small shapes
    for c_in, c_out, with_proj in [(8, 8, False), (4, 8, True)]:
        key, sk = jax.random.split(key)
        x, w1, g, b, m, v, wres = make_case(sk, 2, c_in, c_out, 16, with_proj)
        ref = _reference(x, w1, g, b, m, v, wres)                  # module algebra
        ref_fold = _reference(x, w1, g, b, m, v, wres, fold_bn=True)

        y = jax.block_until_ready(enres_block(x, w1, g, b, m, v, wres))
        assert y.shape == (2, c_out, 16) and y.dtype == jnp.float32
        assert jnp.allclose(y, ref_fold, atol=1e-4, rtol=1e-4), "f32 mismatch"
        assert jnp.allclose(y, ref, atol=5e-2, rtol=5e-2), "f32 module mismatch"

        # bf16 compute (recommended on all generations), f32 accumulate/epilogue
        y16 = jax.block_until_ready(
            enres_block(x, w1, g, b, m, v, wres, compute_dtype=jnp.bfloat16))
        assert jnp.allclose(y16, ref_fold, atol=1e-1, rtol=1e-1), \
            "bf16 compute mismatch"

        # bf16 output stream (for when the downstream layer consumes bf16)
        yo = jax.block_until_ready(
            enres_block(x, w1, g, b, m, v, wres, out_dtype=jnp.bfloat16))
        assert yo.dtype == jnp.bfloat16
        assert jnp.allclose(yo.astype(jnp.float32), ref_fold,
                            atol=2e-2, rtol=2e-2), "bf16 output mismatch"

    # multi-block tiled path: sample-aligned 128-multiple lane blocks, padded batch
    key, sk = jax.random.split(key)
    x, w1, g, b, m, v, wres = make_case(sk, 40, 8, 8, 16, False)
    y = jax.block_until_ready(
        enres_block(x, w1, g, b, m, v, wres, max_block_lanes=256))
    ref_fold = _reference(x, w1, g, b, m, v, wres, fold_bn=True)
    assert y.shape == (40, 8, 16)
    assert jnp.allclose(y, ref_fold, atol=1e-4, rtol=1e-4), "tiled f32 mismatch"

    print("KERNEL_OK")
</pallas_src>

<mosaic_0001>
module attributes {stable_mosaic.version = 11 : i64} {
  func.func @_enres_kernel(%arg0: i32, %arg1: memref<8x32xf32, #tpu.memory_space<vmem>>, %arg2: memref<3x8x8xf32, #tpu.memory_space<vmem>>, %arg3: memref<8x1xf32, #tpu.memory_space<vmem>>, %arg4: memref<8x32xf32, #tpu.memory_space<vmem>>) attributes {dimension_semantics = [#tpu.dimension_semantics<parallel>], iteration_bounds = array<i64: 1>, scalar_prefetch = 0 : i64, scratch_operands = 0 : i64, tpu.core_type = #tpu.core_type<tc>, window_params = [{transform_indices = @transform_0, window_bounds = array<i64: 8, 32>}, {pipeline_mode = #tpu.pipeline_mode<synchronous>, transform_indices = @transform_1, window_bounds = array<i64: 3, 8, 8>}, {pipeline_mode = #tpu.pipeline_mode<synchronous>, transform_indices = @transform_2, window_bounds = array<i64: 8, 1>}, {transform_indices = @transform_3, window_bounds = array<i64: 8, 32>}]} {
    %c0 = arith.constant 0 : index
    %c0_0 = arith.constant 0 : index
    %0 = vector.load %arg1[%c0, %c0_0] : memref<8x32xf32, #tpu.memory_space<vmem>>, vector<8x32xf32>
    %1 = tpu.iota {dimensions = array<i32: 1>} : vector<1x32xi32>
    %c15_i32 = arith.constant 15 : i32
    %2 = vector.broadcast %c15_i32 : i32 to vector<1x32xi32>
    %3 = arith.andi %1, %2 : vector<1x32xi32>
    %c0_i32 = arith.constant 0 : i32
    %4 = vector.broadcast %c0_i32 : i32 to vector<1x32xi32>
    %5 = arith.cmpi eq, %3, %4 : vector<1x32xi32>
    %c1_i32 = arith.constant 1 : i32
    %6 = tpu.dynamic_rotate %0 by %c1_i32 dim 1 : vector<8x32xf32>, i32 -> vector<8x32xf32>
    %cst = arith.constant 0.000000e+00 : f32
    %7 = vector.shape_cast %5 : vector<1x32xi1> to vector<1x32xi1>
    %8 = vector.broadcast %7 : vector<1x32xi1> to vector<8x32xi1>
    %9 = vector.broadcast %cst : f32 to vector<8x32xf32>
    %10 = arith.select %8, %9, %6 : vector<8x32xi1>, vector<8x32xf32>
    %c15_i32_1 = arith.constant 15 : i32
    %11 = vector.broadcast %c15_i32_1 : i32 to vector<1x32xi32>
    %12 = arith.cmpi eq, %3, %11 : vector<1x32xi32>
    %c31_i32 = arith.constant 31 : i32
    %13 = tpu.dynamic_rotate %0 by %c31_i32 dim 1 : vector<8x32xf32>, i32 -> vector<8x32xf32>
    %cst_2 = arith.constant 0.000000e+00 : f32
    %14 = vector.shape_cast %12 : vector<1x32xi1> to vector<1x32xi1>
    %15 = vector.broadcast %14 : vector<1x32xi1> to vector<8x32xi1>
    %16 = vector.broadcast %cst_2 : f32 to vector<8x32xf32>
    %17 = arith.select %15, %16, %13 : vector<8x32xi1>, vector<8x32xf32>
    %c0_3 = arith.constant 0 : index
    %c0_4 = arith.constant 0 : index
    %c0_5 = arith.constant 0 : index
    %18 = vector.load %arg2[%c0_3, %c0_4, %c0_5] : memref<3x8x8xf32, #tpu.memory_space<vmem>>, vector<1x8x8xf32>
    %19 = vector.shape_cast %18 : vector<1x8x8xf32> to vector<8x8xf32>
    %cst_6 = arith.constant dense<0.000000e+00> : vector<8x32xf32>
    %20 = tpu.matmul %19, %10, %cst_6 {dimension_numbers = #tpu.dot_dimension_numbers<[1], [0], [0], [1], [0, 0, 1, 1], [], []>} : vector<8x8xf32>, vector<8x32xf32>, vector<8x32xf32> -> vector<8x32xf32>
    %c1 = arith.constant 1 : index
    %c0_7 = arith.constant 0 : index
    %c0_8 = arith.constant 0 : index
    %21 = vector.load %arg2[%c1, %c0_7, %c0_8] : memref<3x8x8xf32, #tpu.memory_space<vmem>>, vector<1x8x8xf32>
    %22 = vector.shape_cast %21 : vector<1x8x8xf32> to vector<8x8xf32>
    %cst_9 = arith.constant dense<0.000000e+00> : vector<8x32xf32>
    %23 = tpu.matmul %22, %0, %cst_9 {dimension_numbers = #tpu.dot_dimension_numbers<[1], [0], [0], [1], [0, 0, 1, 1], [], []>} : vector<8x8xf32>, vector<8x32xf32>, vector<8x32xf32> -> vector<8x32xf32>
    %24 = arith.addf %20, %23 : vector<8x32xf32>
    %c2 = arith.constant 2 : index
    %c0_10 = arith.constant 0 : index
    %c0_11 = arith.constant 0 : index
    %25 = vector.load %arg2[%c2, %c0_10, %c0_11] : memref<3x8x8xf32, #tpu.memory_space<vmem>>, vector<1x8x8xf32>
    %26 = vector.shape_cast %25 : vector<1x8x8xf32> to vector<8x8xf32>
    %cst_12 = arith.constant dense<0.000000e+00> : vector<8x32xf32>
    %27 = tpu.matmul %26, %17, %cst_12 {dimension_numbers = #tpu.dot_dimension_numbers<[1], [0], [0], [1], [0, 0, 1, 1], [], []>} : vector<8x8xf32>, vector<8x32xf32>, vector<8x32xf32> -> vector<8x32xf32>
    %28 = arith.addf %24, %27 : vector<8x32xf32>
    %c0_13 = arith.constant 0 : index
    %c0_14 = arith.constant 0 : index
    %29 = vector.load %arg3[%c0_13, %c0_14] : memref<8x1xf32, #tpu.memory_space<vmem>>, vector<8x1xf32>
    %30 = vector.broadcast %29 : vector<8x1xf32> to vector<8x32xf32>
    %31 = arith.addf %28, %30 : vector<8x32xf32>
    %cst_15 = arith.constant 0.000000e+00 : f32
    %32 = vector.broadcast %cst_15 : f32 to vector<8x32xf32>
    %33 = arith.maximumf %31, %32 : vector<8x32xf32>
    %34 = arith.addf %33, %0 : vector<8x32xf32>
    %c0_16 = arith.constant 0 : index
    %c0_17 = arith.constant 0 : index
    %35 = vector.load %arg4[%c0_16, %c0_17] : memref<8x32xf32, #tpu.memory_space<vmem>>, vector<8x32xf32>
    tpu.vector_store %arg4[%c0_16, %c0_17], %34 {strides = array<i32>} : memref<8x32xf32, #tpu.memory_space<vmem>>, vector<8x32xf32>,
    return
  }
  func.func @transform_0(%arg0: i32) -> (i32, i32) {
    %c0_i32 = arith.constant 0 : i32
    %c0_i32_0 = arith.constant 0 : i32
    return %c0_i32, %arg0 : i32, i32
  }
  func.func @transform_1(%arg0: i32) -> (i32, i32, i32) {
    %c0_i32 = arith.constant 0 : i32
    %c0_i32_0 = arith.constant 0 : i32
    %c0_i32_1 = arith.constant 0 : i32
    %c0_i32_2 = arith.constant 0 : i32
    return %c0_i32, %c0_i32_0, %c0_i32_1 : i32, i32, i32
  }
  func.func @transform_2(%arg0: i32) -> (i32, i32) {
    %c0_i32 = arith.constant 0 : i32
    %c0_i32_0 = arith.constant 0 : i32
    %c0_i32_1 = arith.constant 0 : i32
    return %c0_i32, %c0_i32_0 : i32, i32
  }
  func.func @transform_3(%arg0: i32) -> (i32, i32) {
    %c0_i32 = arith.constant 0 : i32
    %c0_i32_0 = arith.constant 0 : i32
    return %c0_i32, %arg0 : i32, i32
  }
}

</mosaic_0001>

<bundles_post_ra>
// kernel: enres_block.1
= control target key start
LH: loop header
LB: loop body
LE: loop exit
PB: predicated region body
PF: predicated region fallthrough
CT: control target
= control target key end

     0   :  { %s320_s14 = smov 32   ;;  %v321_v1 = vmov 0.0   ;;  %vm19_vm0 = vcmask 1047808   ;;  %vm322_vm1 = vmmov 0   ;;  %vm43_vm2 = vcmask 64512   ;;  %s324_s18 = smov 97   ;;  %s369_s0 = inlined_call_operand.vmem [shape: f32[8,32], index: 0, kind: input, shape index: {}]   ;;  %s370_s1 = inlined_call_operand.vmem [shape: f32[3,8,8], index: 1, kind: input, shape index: {}]   ;;  %s371_s2 = inlined_call_operand.vmem [shape: f32[8,1], index: 2, kind: input, shape index: {}]   ;;  %s372_s3 = inlined_call_operand.vmem [shape: f32[8,32], index: 3, kind: output, shape index: {}]  }
   0x1   :  { %v14_v0 = vld [vmem:[%s369_s0] sm:$0xff]  ;;  %303 = vmatprep.subr.mxu1 %v321_v1  ;;  %298 = vmatprep.subr.mxu0 %v321_v1  ;;  %v281_v4 = vld [vmem:[%s370_s1 + $0x8] sm:$0xff]  ;;  %v323_v5 = vmov 0   ;;  %s325_s19 = smov 127   ;;  %v15_v9 = vlaneseq  ;;  %v286_v14 = vld [vmem:[%s370_s1 + $0x10] sm:$0xff]  ;;  %vm275_vm5 = vcmask 261120  }
   0x2   :  { %20 = vrot.lane.b32.xlu0 %v14_v0, %s320_s14  ;;  %299 = vmatpush3.msra.mxu0 %v14_v0  ;;  %v266_v6 = vld [vmem:[%s371_s2] sm:$0xff] }
   0x3   :  { %308 = vmatprep.subr.mxu0 %v321_v1  ;;  %300 = vmatprep.mubr.msk.f32.mxu0 %vm322_vm1, %v321_v1  ;;  %v16_v10 = vand.u32 127, %v15_v9  ;;  %v40_v12 = vld [vmem:[%s370_s1] sm:$0xff] }
   0x4   :  { %305 = vmatprep.mubr.msk.f32.mxu1 %vm322_vm1, %v321_v1  ;;  %301 = vmatmul.mubr.msk.f32.vlgmr.msra.gmra.mrb[0].mxu0 %vm43_vm2, %v281_v4 }
   0x5   :  { %310 = vmatprep.mubr.msk.f32.mxu0 %vm322_vm1, %v321_v1  ;;  %319 = vset.pattern.permute.xlu0 %v323_v5  ;;  %v17_v11 = vand.u32 15, %v16_v10 }
   0x7   :  { %vm290_vm3 = vcmp.ne.s32.totalorder %v17_v11, 0  ;;  %vm291_vm4 = vcmp.ne.s32.totalorder %v17_v11, 15 }
  0x74   :  { %v21_v2 = vpop.permute.xlu0 %20 }
  0x75   :  { %v22_v3 = vsel %vm19_vm0, %v21_v2, %v14_v0 }
  0x76   :  { %23 = vrot.lane.b32.xlu0 %v22_v3, %s320_s14 }
  0x7a   :  { %269 = vperm.xlu0 %319, %v266_v6  }
  0xd7   :  { %v113_v16 = vpop.f32.mrb[0].mxu0 }
  0xd8   :  { %v302_v17 = vpop.f32.mrb[1].mxu0 }
  0xe8   :  { %v24_v7 = vpop.permute.xlu0 %23 }
  0xe9   :  { %v25_v8 = vsel %vm19_vm0, %v24_v7, %v14_v0 }
  0xea   :  { %29 = vrot.lane.b32.xlu1 %v25_v8, %s324_s18 }
  0xee   :  { %36 = vrot.lane.b32.xlu1 %v25_v8, %s325_s19 }
  0xf9   :  { %v270_v22 = vpop.permute.xlu0 %269 }
 0x15c   :  { %v30_v13 = vpop.permute.xlu1 %29 }
 0x15d   :  { %304 = vmatpush3.msk.msra.mxu1 %vm290_vm3, %v30_v13 }
 0x15e   :  { %306 = vmatmul.mubr.msk.f32.vlgmr.msra.gmra.mrb[0].mxu1 %vm43_vm2, %v40_v12 }
 0x160   :  { %v37_v15 = vpop.permute.xlu1 %36 }
 0x161   :  { %309 = vmatpush3.msk.msra.mxu0 %vm291_vm4, %v37_v15 }
 0x162   :  { %311 = vmatmul.mubr.msk.f32.vlgmr.msra.gmra.mrb[2].mxu0 %vm43_vm2, %v286_v14 }
 0x231   :  { %v186_v18 = vpop.f32.mrb[0].mxu1 }
 0x232   :  { %v187_v19 = vadd.f32 %v186_v18, %v113_v16  ;;  %v307_v20 = vpop.f32.mrb[1].mxu1 }
 0x235   :  { %v261_v21 = vpop.f32.mrb[2].mxu0 }
 0x236   :  { %v265_v23 = vadd.f32 %v261_v21, %v187_v19  ;;  %v312_v24 = vpop.f32.mrb[3].mxu0 }
 0x238   :  { %v272_v25 = vadd.f32 %v270_v22, %v265_v23 }
 0x23a   :  { %v273_v26 = vmax.f32 %v272_v25, 0.0 }
 0x23c   :  { %v274_v27 = vadd.f32 %v273_v26, %v14_v0 }
 0x23e   :  { %276 = vst.msk [vmem:[%s372_s3] sm:$0xff] %vm275_vm5, %v274_v27 }

</bundles_post_ra>
